<compile_context>
chip_gen: v5e
topology: v5e:2x2
jax: 0.10.0
libtpu: 0.0.40
codegen_flags: <defaults>
</compile_context>

<pallas_src>
import numpy as np
import jax
import jax.numpy as jnp
from jax import lax
from jax.experimental import pallas as pl
from jax.experimental.pallas import tpu as pltpu

_LANE = 128
_SMALL_C_THRESHOLD = 16                  # <= this -> VPU FMA path, skip MXU
_VMEM_BUDGET_BYTES = 24 * 1024 * 1024    # conservative kernel working-set cap
_VMEM_LIMIT_BYTES = 32 * 1024 * 1024     # explicit scoped-VMEM limit (all gens)
_MAX_TILE_N = 4096                       # cap when growing tiles for tiny heads


def _proj_en_kernel(x_ref, w_ref, b_ref, o_ref):
    """o[E, TN] = W[E, C] @ x[C, TN] + b[E, 1]   (spatial dim lane-dense)."""
    C = x_ref.shape[0]
    bias = b_ref[...].astype(jnp.float32)                      # (E, 1)
    if C <= _SMALL_C_THRESHOLD:
        # Tiny contraction dim: a handful of unrolled VPU broadcast-FMAs is
        # cheaper than an MXU pass with K padded to 128.
        x = x_ref[...].astype(jnp.float32)                     # (C, TN)
        w = w_ref[...].astype(jnp.float32)                     # (E, C)
        acc = jnp.broadcast_to(bias, o_ref.shape)
        for c in range(C):                                     # static unroll
            acc = acc + w[:, c:c + 1] * x[c:c + 1, :]
        o_ref[...] = acc.astype(o_ref.dtype)
    else:
        acc = jnp.dot(w_ref[...], x_ref[...],
                      preferred_element_type=jnp.float32)      # (E, TN)
        o_ref[...] = (acc + bias).astype(o_ref.dtype)


def _proj_ne_kernel(x_ref, w_ref, b_ref, o_ref):
    """o[TN, E] = x[C, TN]^T @ Wt[C, E] + b[1, E]   (E a multiple of 128)."""
    acc = lax.dot_general(x_ref[...], w_ref[...],
                          dimension_numbers=(((0,), (0,)), ((), ())),
                          preferred_element_type=jnp.float32)  # (TN, E)
    o_ref[...] = (acc + b_ref[...].astype(jnp.float32)).astype(o_ref.dtype)


def _vmem_bytes(tile_n, C, E, in_bytes, out_bytes):
    # double-buffered activation + output tiles, (conservatively) double-
    # buffered resident weight, + bias.
    return (2 * tile_n * C * in_bytes
            + 2 * tile_n * E * out_bytes
            + 2 * C * E * in_bytes
            + 2 * E * 4)


def _round_up(v, m):
    return ((v + m - 1) // m) * m


def _pick_tile_n(N, C, E, in_bytes, out_bytes, desired):
    if N <= desired:
        return N                          # full-extent block is always legal
    tile = max(_LANE, (desired // _LANE) * _LANE)
    # Shrink until the double-buffered working set fits the VMEM budget.
    while tile > _LANE and _vmem_bytes(tile, C, E, in_bytes, out_bytes) > _VMEM_BUDGET_BYTES:
        tile = max(_LANE, ((tile // 2) // _LANE) * _LANE)
    # Grow for tiny heads (small C*E): fewer grid steps -> less per-step
    # overhead, still well inside the VMEM budget.
    n_cap = _round_up(N, _LANE)
    while (tile * 2 <= _MAX_TILE_N and tile * 2 <= n_cap
           and _vmem_bytes(tile * 2, C, E, in_bytes, out_bytes) <= _VMEM_BUDGET_BYTES):
        tile *= 2
    return tile


def mlp_forward(x_nchw, weight, bias, *, tile_n=1024,
                compute_dtype=jnp.bfloat16, out_dtype=None):
    """SegFormer MLP forward: (B, C, H, W) -> (B, H*W, E).

    weight: (E, C)  (PyTorch nn.Linear layout),  bias: (E,)
    """
    B, C, H, W = x_nchw.shape
    E, C_w = weight.shape
    assert C_w == C, (C_w, C)
    N = H * W
    out_dtype = x_nchw.dtype if out_dtype is None else out_dtype
    compute_dtype = x_nchw.dtype if compute_dtype is None else compute_dtype

    # NCHW -> (B, C, N) is a free row-major reshape; the kernel reads
    # (C, tile_n) blocks of this view directly, fusing flatten+transpose into
    # the contraction. (In a real model the bf16 cast fuses with the producer.)
    x3 = x_nchw.reshape(B, C, N).astype(compute_dtype)
    w = weight.astype(compute_dtype)                           # (E, C)
    b = bias.astype(jnp.float32)

    in_bytes = np.dtype(compute_dtype).itemsize
    out_bytes = np.dtype(out_dtype).itemsize
    tn = _pick_tile_n(N, C, E, in_bytes, out_bytes, tile_n)
    grid = (B, pl.cdiv(N, tn))

    cparams = pltpu.CompilerParams(
        dimension_semantics=("parallel", "parallel"),
        vmem_limit_bytes=_VMEM_LIMIT_BYTES,
    )
    cost = pl.CostEstimate(
        flops=2 * B * N * C * E,
        transcendentals=0,
        bytes_accessed=(B * N * C * in_bytes       # activations in
                        + C * E * in_bytes         # weight
                        + E * 4                    # bias
                        + B * N * E * out_bytes),  # output
    )
    x_spec = pl.BlockSpec((None, C, tn), lambda bi, j: (bi, 0, j))

    if E % _LANE == 0:
        # Lane-dense (tile_n, E) output blocks written straight to (B, N, E).
        return pl.pallas_call(
            _proj_ne_kernel,
            out_shape=jax.ShapeDtypeStruct((B, N, E), out_dtype),
            grid_spec=pltpu.PrefetchScalarGridSpec(
                num_scalar_prefetch=0,
                grid=grid,
                in_specs=[
                    x_spec,
                    pl.BlockSpec((C, E), lambda bi, j: (0, 0)),   # W^T resident
                    pl.BlockSpec((1, E), lambda bi, j: (0, 0)),   # bias row
                ],
                out_specs=pl.BlockSpec((None, tn, E), lambda bi, j: (bi, j, 0)),
            ),
            compiler_params=cparams,
            cost_estimate=cost,
        )(x3, w.T, b.reshape(1, E))

    # Small / odd E: keep the big spatial dim on lanes inside the kernel
    # (unmasked stores), then let XLA transpose the small output to (B, N, E).
    out_en = pl.pallas_call(
        _proj_en_kernel,
        out_shape=jax.ShapeDtypeStruct((B, E, N), out_dtype),
        grid_spec=pltpu.PrefetchScalarGridSpec(
            num_scalar_prefetch=0,
            grid=grid,
            in_specs=[
                x_spec,
                pl.BlockSpec((E, C), lambda bi, j: (0, 0)),       # W resident
                pl.BlockSpec((E, 1), lambda bi, j: (0, 0)),       # bias col
            ],
            out_specs=pl.BlockSpec((None, E, tn), lambda bi, j: (bi, 0, j)),
        ),
        compiler_params=cparams,
        cost_estimate=cost,
    )(x3, w, b.reshape(E, 1))
    return jnp.transpose(out_en, (0, 2, 1))


def _reference(x_nchw, weight, bias):
    B, C, H, W = x_nchw.shape
    x = jnp.transpose(x_nchw.reshape(B, C, H * W), (0, 2, 1)).astype(jnp.float32)
    return (jnp.einsum("bnc,ec->bne", x, weight.astype(jnp.float32),
                       precision=lax.Precision.HIGHEST)
            + bias.astype(jnp.float32))


if __name__ == "__main__":
    key = jax.random.PRNGKey(0)

    def make_inputs(k, B, C, H, W, E):
        kx, kw, kb = jax.random.split(k, 3)
        x = jax.random.normal(kx, (B, C, H, W), dtype=jnp.float32)
        weight = jax.random.normal(kw, (E, C), dtype=jnp.float32) * 0.02
        bias = jax.random.normal(kb, (E,), dtype=jnp.float32) * 0.02
        return x, weight, bias

    k1, k2, k3 = jax.random.split(key, 3)

    # Config 1: module-consistent small shape (B=2, C=4, H=W=16, E=32).
    # Exercises fused-transpose read, small-C VPU-FMA path, (E, tile_n) output.
    x, w_, b_ = make_inputs(k1, 2, 4, 16, 16, 32)
    ref = _reference(x, w_, b_)

    out_f32 = jax.block_until_ready(
        mlp_forward(x, w_, b_, compute_dtype=jnp.float32))      # exact path
    assert out_f32.shape == (2, 256, 32)
    assert jnp.allclose(out_f32.astype(jnp.float32), ref, atol=1e-5, rtol=1e-5)

    out_bf16 = jax.block_until_ready(mlp_forward(x, w_, b_))    # bf16 fast path
    assert jnp.allclose(out_bf16.astype(jnp.float32), ref, atol=1e-2, rtol=1e-2)

    # Config 2: E multiple of 128 -> direct lane-dense (tile_n, E) MXU path.
    x2, w2, b2 = make_inputs(k2, 1, 64, 8, 8, 128)
    out2 = jax.block_until_ready(mlp_forward(x2, w2, b2))
    assert out2.shape == (1, 64, 128)
    assert jnp.allclose(out2.astype(jnp.float32), _reference(x2, w2, b2),
                        atol=1e-2, rtol=1e-2)

    # Config 3: C above the FMA threshold, E not a 128-multiple -> MXU branch
    # of the (E, tile_n) kernel.
    x3_, w3, b3 = make_inputs(k3, 1, 32, 8, 8, 96)
    out3 = jax.block_until_ready(mlp_forward(x3_, w3, b3))
    assert out3.shape == (1, 64, 96)
    assert jnp.allclose(out3.astype(jnp.float32), _reference(x3_, w3, b3),
                        atol=1e-2, rtol=1e-2)

    print("KERNEL_OK")
</pallas_src>

<mosaic_0001>
module attributes {stable_mosaic.version = 11 : i64} {
  func.func @_proj_en_kernel(%arg0: i32, %arg1: i32, %arg2: memref<1x4x256xf32, #tpu.memory_space<vmem>>, %arg3: memref<32x4xf32, #tpu.memory_space<vmem>>, %arg4: memref<32x1xf32, #tpu.memory_space<vmem>>, %arg5: memref<1x32x256xf32, #tpu.memory_space<vmem>>) attributes {dimension_semantics = [#tpu.dimension_semantics<parallel>, #tpu.dimension_semantics<parallel>], iteration_bounds = array<i64: 2, 1>, scalar_prefetch = 0 : i64, scratch_operands = 0 : i64, tpu.core_type = #tpu.core_type<tc>, window_params = [{transform_indices = @transform_0, window_bounds = array<i64: 1, 4, 256>}, {pipeline_mode = #tpu.pipeline_mode<synchronous>, transform_indices = @transform_1, window_bounds = array<i64: 32, 4>}, {pipeline_mode = #tpu.pipeline_mode<synchronous>, transform_indices = @transform_2, window_bounds = array<i64: 32, 1>}, {transform_indices = @transform_3, window_bounds = array<i64: 1, 32, 256>}]} {
    %c0 = arith.constant 0 : index
    %c0_0 = arith.constant 0 : index
    %0 = vector.load %arg4[%c0, %c0_0] : memref<32x1xf32, #tpu.memory_space<vmem>>, vector<32x1xf32>
    %c0_1 = arith.constant 0 : index
    %c0_2 = arith.constant 0 : index
    %c0_3 = arith.constant 0 : index
    %1 = vector.load %arg2[%c0_1, %c0_2, %c0_3] : memref<1x4x256xf32, #tpu.memory_space<vmem>>, vector<1x4x256xf32>
    %2 = vector.shape_cast %1 : vector<1x4x256xf32> to vector<4x256xf32>
    %c0_4 = arith.constant 0 : index
    %c0_5 = arith.constant 0 : index
    %3 = vector.load %arg3[%c0_4, %c0_5] : memref<32x4xf32, #tpu.memory_space<vmem>>, vector<32x4xf32>
    %4 = vector.shape_cast %0 : vector<32x1xf32> to vector<32x1xf32>
    %5 = vector.broadcast %4 : vector<32x1xf32> to vector<32x256xf32>
    %6 = vector.extract_strided_slice %3 {offsets = [0, 0], sizes = [32, 1], strides = [1, 1]} : vector<32x4xf32> to vector<32x1xf32>
    %7 = vector.extract_strided_slice %2 {offsets = [0, 0], sizes = [1, 256], strides = [1, 1]} : vector<4x256xf32> to vector<1x256xf32>
    %8 = vector.broadcast %6 : vector<32x1xf32> to vector<32x256xf32>
    %9 = vector.broadcast %7 : vector<1x256xf32> to vector<32x256xf32>
    %10 = arith.mulf %8, %9 : vector<32x256xf32>
    %11 = arith.addf %5, %10 : vector<32x256xf32>
    %12 = vector.extract_strided_slice %3 {offsets = [0, 1], sizes = [32, 1], strides = [1, 1]} : vector<32x4xf32> to vector<32x1xf32>
    %13 = vector.extract_strided_slice %2 {offsets = [1, 0], sizes = [1, 256], strides = [1, 1]} : vector<4x256xf32> to vector<1x256xf32>
    %14 = vector.broadcast %12 : vector<32x1xf32> to vector<32x256xf32>
    %15 = vector.broadcast %13 : vector<1x256xf32> to vector<32x256xf32>
    %16 = arith.mulf %14, %15 : vector<32x256xf32>
    %17 = arith.addf %11, %16 : vector<32x256xf32>
    %18 = vector.extract_strided_slice %3 {offsets = [0, 2], sizes = [32, 1], strides = [1, 1]} : vector<32x4xf32> to vector<32x1xf32>
    %19 = vector.extract_strided_slice %2 {offsets = [2, 0], sizes = [1, 256], strides = [1, 1]} : vector<4x256xf32> to vector<1x256xf32>
    %20 = vector.broadcast %18 : vector<32x1xf32> to vector<32x256xf32>
    %21 = vector.broadcast %19 : vector<1x256xf32> to vector<32x256xf32>
    %22 = arith.mulf %20, %21 : vector<32x256xf32>
    %23 = arith.addf %17, %22 : vector<32x256xf32>
    %24 = vector.extract_strided_slice %3 {offsets = [0, 3], sizes = [32, 1], strides = [1, 1]} : vector<32x4xf32> to vector<32x1xf32>
    %25 = vector.extract_strided_slice %2 {offsets = [3, 0], sizes = [1, 256], strides = [1, 1]} : vector<4x256xf32> to vector<1x256xf32>
    %26 = vector.broadcast %24 : vector<32x1xf32> to vector<32x256xf32>
    %27 = vector.broadcast %25 : vector<1x256xf32> to vector<32x256xf32>
    %28 = arith.mulf %26, %27 : vector<32x256xf32>
    %29 = arith.addf %23, %28 : vector<32x256xf32>
    %c0_6 = arith.constant 0 : index
    %c0_7 = arith.constant 0 : index
    %c0_8 = arith.constant 0 : index
    %30 = vector.load %arg5[%c0_6, %c0_7, %c0_8] : memref<1x32x256xf32, #tpu.memory_space<vmem>>, vector<1x32x256xf32>
    %31 = vector.shape_cast %30 : vector<1x32x256xf32> to vector<32x256xf32>
    %32 = vector.shape_cast %29 : vector<32x256xf32> to vector<1x32x256xf32>
    tpu.vector_store %arg5[%c0_6, %c0_7, %c0_8], %32 {strides = array<i32>} : memref<1x32x256xf32, #tpu.memory_space<vmem>>, vector<1x32x256xf32>,
    return
  }
  func.func @transform_0(%arg0: i32, %arg1: i32) -> (i32, i32, i32) {
    %c0_i32 = arith.constant 0 : i32
    %c0_i32_0 = arith.constant 0 : i32
    return %arg0, %c0_i32, %arg1 : i32, i32, i32
  }
  func.func @transform_1(%arg0: i32, %arg1: i32) -> (i32, i32) {
    %c0_i32 = arith.constant 0 : i32
    %c0_i32_0 = arith.constant 0 : i32
    %c0_i32_1 = arith.constant 0 : i32
    return %c0_i32, %c0_i32_0 : i32, i32
  }
  func.func @transform_2(%arg0: i32, %arg1: i32) -> (i32, i32) {
    %c0_i32 = arith.constant 0 : i32
    %c0_i32_0 = arith.constant 0 : i32
    %c0_i32_1 = arith.constant 0 : i32
    return %c0_i32, %c0_i32_0 : i32, i32
  }
  func.func @transform_3(%arg0: i32, %arg1: i32) -> (i32, i32, i32) {
    %c0_i32 = arith.constant 0 : i32
    %c0_i32_0 = arith.constant 0 : i32
    return %arg0, %c0_i32, %arg1 : i32, i32, i32
  }
}

</mosaic_0001>

<bundles_post_ra>
// kernel: tpu_custom_call.1
= control target key start
LH: loop header
LB: loop body
LE: loop exit
PB: predicated region body
PF: predicated region fallthrough
CT: control target
= control target key end

     0   :  { %8 = vsyncpa [#allocation3], 0  ;;  %s869_s0 = inlined_call_operand.vmem [shape: f32[2,4,256], index: 0, kind: input, shape index: {}]   ;;  %s870_s1 = inlined_call_operand.vmem [shape: f32[32,4], index: 1, kind: input, shape index: {}]   ;;  %s871_s2 = inlined_call_operand.vmem [shape: f32[32,1], index: 2, kind: input, shape index: {}]   ;;  %s872_s3 = inlined_call_operand.hbm [shape: f32[2,32,256], index: 3, kind: output, shape index: {}]  }
   0x1   :  { %10 = vsyncpa [#allocation3 + $0x1], 0  ;;  %s685_s12 = smov 0   ;;  %s687_s13 = smov 0  }
   0x2   :  { %s689_s14 = smov 0   ;;  %s691_s15 = smov 0  }
   0x3   :  { %s693_s16 = smov 0   ;;  %s695_s17 = smov 0  }
   0x4 LB: > { %s491_s18 = sadd.s32 4294967295, %s657_s17   ;;  %s492_s19 = sadd.s32 4294967294, %s657_s17   ;;  %s657_s17 = sphi %s695_s17, %s16_s17   ;;  %s653_s16 = sphi %s693_s16, %s879_s16   ;;  %s649_s15 = sphi %s691_s15, %s878_s15   ;;  %s645_s14 = sphi %s689_s14, %s877_s14   ;;  %s641_s13 = sphi %s687_s13, %s876_s13   ;;  %s637_s12 = sphi %s685_s12, %s875_s12  }
   0x5   : > { %s28_s20 = sadd.s32 1, %s653_s16  ;;  %s107_s21 = sadd.s32 1, %s645_s14 }
   0x6   : > { %p30_p0 = scmp.ge.s32.totalorder %s28_s20, 2  ;;  %p117_p1 = scmp.ne.s32.totalorder %s645_s14, %s641_s13 }
   0x7   : > { %p118_p2 = scmp.eq.s32.totalorder %s491_s18, 1  ;;  %p123_p3 = scmp.ne.s32.totalorder %s641_s13, %s637_s12 }
   0x8   : > { %s881_s20 = smov (%p30_p0, %s28_s20), 0  ;;  %p124_p5 = scmp.eq.s32.totalorder %s492_s19, 1 }
   0x9   : > { %p725_p4 = por %p118_p2, %p117_p1  ;;  %s102_s23 = ssub.s32 %s653_s16, %s881_s20 }
   0xa   : > { %p495_p6 = scmp.ge.s32.totalorder %s657_s17, 1  ;;  %p105_p7 = scmp.eq.s32.totalorder %s102_s23, 0 }
   0xb   : > { %p732_p8 = por %p124_p5, %p123_p3  ;;  %p161_p9 = scmp.lt.s32.totalorder %s657_s17, 3 }
   0xc   : > { %s738_s25 = scalar_select %p105_p7, %s645_s14, %s107_s21  }
   0xd   : > { %p162_p10 = pnand %p495_p6, %p161_p9 }
   0xe   : > { %p190_p11 = scmp.lt.s32.totalorder (!%p162_p10), %s649_s15, 1  ;;  %s186_s30 = sand.u32 (!%p162_p10), 1, %s641_s13  }
   0xf   : > { %165 = sbr.rel (%p162_p10) target bundleno = 197 (0xc5), region = 32  ;;  %s496_s4 = sshll.u32 (!%p162_p10), %s186_s30, 6 }
  0x10   : > { %s806_s5 = scalar_lea.vmem (!%p162_p10), [#allocation2], %s496_s4  ;;  %s505_s6 = sshll.u32 (!%p162_p10), %s649_s15, 6 }
  0x11   : > { %s408_s9 = scalar_lea.hbm (!%p162_p10), %s872_s3, %s505_s6  ;;  %s395_s11 = scalar_lea.sflag (!%p162_p10), [#allocation3], %s186_s30 }
  0x12   : > { %s411_s10 = sshll.u32 (!%p162_p10), %s408_s9, 4  ;;  %s412_s10 = int_to_ptr.hbm [resolvable:$true] %s411_s10 }
  0x13   : > { %s593_s18 = sshra.s32 (!%p162_p10), %s412_s10, 4  ;;  %s594_s18 = int_to_ptr.hbm [resolvable:$true] %s593_s18 }
  0x14   : > { %v202_v0 = vld [vmem:[%s871_s2 + $0x10] sm:$0xff]  ;;  %v200_v1 = vld [vmem:[%s871_s2] sm:$0xff]  ;;  %v659_v2 = vmov 0   ;;  %v203_v4 = vld [vmem:[%s871_s2 + $0x18] sm:$0xff]  ;;  %v660_v9 = vmov 1   ;;  %v661_v10 = vmov 2   ;;  %p600_p1 = scmp.lt.s32.totalorder %s594_s18, %s872_s3 }
  0x15   : > { %568 = vset.pattern.permute.xlu1 %v659_v2  ;;  %567 = vset.pattern.permute.xlu0 %v659_v2  ;;  %v205_v3 = vld [vmem:[%s870_s1] sm:$0xff]  ;;  %v201_v5 = vld [vmem:[%s871_s2 + $0x8] sm:$0xff]  ;;  %v208_v7 = vld [vmem:[%s870_s1 + $0x18] sm:$0xff]  ;;  %v662_v11 = vmov 3   ;;  %s191_s23 = scalar_select %p190_p11, %s649_s15, 1 }
  0x16   : > { %221 = vperm.xlu1 %568, %v202_v0   ;;  %211 = vperm.xlu0 %567, %v200_v1   ;;  %v206_v6 = vld [vmem:[%s870_s1 + $0x8] sm:$0xff]  ;;  %v207_v8 = vld [vmem:[%s870_s1 + $0x10] sm:$0xff]  ;;  %s409_s15 = sshll.u32 %s806_s5, 4  ;;  %s595_s19 = scalar_lea.hbm %s594_s18, 64  ;;  %s410_s15 = int_to_ptr.vmem [resolvable:$true] %s409_s15 }
  0x17   : > { %569 = vset.pattern.permute.xlu2 %v659_v2  ;;  %s504_s26 = sshll.u32 %s191_s23, 3  ;;  %p596_p12 = scmp.ne.s32.totalorder %s594_s18, %s595_s19 }
  0x18   : > { %231 = vperm.xlu2 %569, %v205_v3   ;;  %s197_s29 = scalar_lea.vmem %s869_s0, %s504_s26  ;;  %s599_s26 = scalar_lea.hbm %s872_s3, 128 }
  0x19   : > { %v204_v21 = vld [vmem:[%s197_s29] sm:$0xff]  ;;  %p597_p13 = pnand %p596_p12, %p725_p4  ;;  %p601_p2 = scmp.lt.s32.totalorder %s599_s26, %s595_s19 }
  0x1a   : > { %v250_v22 = vperm.slane %v204_v21, 0  ;;  %v251_v25 = vperm.slane %v204_v21, 4  ;;  %v288_v27 = vperm.slane %v204_v21, 1  ;;  %v289_v29 = vperm.slane %v204_v21, 5 }
  0x1b   : > { %v364_v37 = vperm.slane %v204_v21, 3  ;;  %v365_v38 = vperm.slane %v204_v21, 7  ;;  %v326_v39 = vperm.slane %v204_v21, 2  ;;  %v327_v40 = vperm.slane %v204_v21, 6  ;;  %p598_p0 = pneg %p597_p13  ;;  %p602_p3 = por %p601_p2, %p600_p1 }
  0x1c   : > { %v254_v26 = vperm.slane %v250_v22, 0  ;;  %v255_v28 = vperm.slane %v251_v25, 0  ;;  %v779_v32 = vperm.slane %v288_v27, 1  ;;  %v781_v34 = vperm.slane %v289_v29, 1 }
  0x1d   : > { %v787_v47 = vperm.slane %v364_v37, 3  ;;  %v791_v50 = vperm.slane %v365_v38, 3  ;;  %v330_v51 = vperm.slane %v326_v39, 2  ;;  %v331_v56 = vperm.slane %v327_v40, 2  ;;  %p603_p5 = pnand %p602_p3, %p598_p0 }
  0x1e   : > { %226 = vperm.xlu1 %568, %v203_v4   ;;  %216 = vperm.xlu0 %567, %v201_v5  }
  0x20   : > { %236 = vperm.xlu2 %569, %v206_v6  }
  0x26   : > { %246 = vperm.xlu1 %568, %v208_v7   ;;  %241 = vperm.xlu0 %567, %v207_v8  }
  0x28   : > { %570 = vset.pattern.permute.xlu2 %v660_v9 }
  0x29   : > { %273 = vperm.xlu2 %570, %v205_v3  }
  0x2e   : > { %572 = vset.pattern.permute.xlu1 %v660_v9  ;;  %571 = vset.pattern.permute.xlu0 %v660_v9 }
  0x2f   : > { %281 = vperm.xlu1 %572, %v207_v8   ;;  %277 = vperm.xlu0 %571, %v206_v6  }
  0x31   : > { %285 = vperm.xlu2 %570, %v208_v7  }
  0x37   : > { %573 = vset.pattern.permute.xlu1 %v661_v10  ;;  %575 = vset.pattern.permute.xlu0 %v661_v10 }
  0x38   : > { %311 = vperm.xlu1 %573, %v205_v3   ;;  %319 = vperm.xlu0 %575, %v207_v8  }
  0x39   : > { %574 = vset.pattern.permute.xlu2 %v661_v10 }
  0x3a   : > { %315 = vperm.xlu2 %574, %v206_v6  }
  0x40   : > { %323 = vperm.xlu1 %573, %v208_v7   ;;  %578 = vset.pattern.permute.xlu0 %v662_v11 }
  0x41   : > { %361 = vperm.xlu0 %578, %v208_v7  }
  0x42   : > { %576 = vset.pattern.permute.xlu2 %v662_v11 }
  0x43   : > { %349 = vperm.xlu2 %576, %v205_v3  }
  0x48   : > { %577 = vset.pattern.permute.xlu1 %v662_v11 }
  0x49   : > { %353 = vperm.xlu1 %577, %v206_v6  }
  0x4b   : > { %357 = vperm.xlu2 %576, %v207_v8  }
  0x72   : > { %v232_v12 = vpop.permute.xlu2 %231 }
  0x73   : > { %v256_v31 = vmul.f32 %v254_v26, %v232_v12  ;;  %v257_v33 = vmul.f32 %v255_v28, %v232_v12 }
  0x7a   : > { %v764_v13 = vpop.permute.xlu2 %236 }
  0x7b   : > { %v258_v25 = vmul.f32 %v254_v26, %v764_v13  ;;  %v259_v27 = vmul.f32 %v255_v28, %v764_v13 }
  0x83   : > { %v274_v14 = vpop.permute.xlu2 %273 }
  0x84   : > { %v294_v42 = vmul.f32 %v779_v32, %v274_v14  ;;  %v295_v46 = vmul.f32 %v781_v34, %v274_v14 }
  0x88   : > { %v222_v15 = vpop.permute.xlu1 %221  ;;  %v212_v16 = vpop.permute.xlu0 %211 }
  0x89   : > { %v264_v41 = vadd.f32 %v256_v31, %v212_v16  ;;  %v265_v45 = vadd.f32 %v257_v33, %v212_v16 }
  0x8b   : > { %v768_v17 = vpop.permute.xlu2 %285  ;;  %v302_v53 = vadd.f32 %v294_v42, %v264_v41  ;;  %v303_v57 = vadd.f32 %v295_v46, %v265_v45 }
  0x8c   : > { %v300_v12 = vmul.f32 %v779_v32, %v768_v17  ;;  %v301_v14 = vmul.f32 %v781_v34, %v768_v17 }
  0x90   : > { %v770_v18 = vpop.permute.xlu1 %226  ;;  %v772_v19 = vpop.permute.xlu0 %216 }
  0x91   : > { %v266_v39 = vadd.f32 %v258_v25, %v772_v19  ;;  %v267_v40 = vadd.f32 %v259_v27, %v772_v19 }
  0x94   : > { %v777_v20 = vpop.permute.xlu2 %315 }
  0x95   : > { %v334_v42 = vmul.f32 %v330_v51, %v777_v20 }
  0x98   : > { %v247_v23 = vpop.permute.xlu1 %246  ;;  %v242_v24 = vpop.permute.xlu0 %241 }
  0x99   : > { %v260_v43 = vmul.f32 %v254_v26, %v242_v24  ;;  %v261_v44 = vmul.f32 %v255_v28, %v242_v24  ;;  %v262_v58 = vmul.f32 %v254_v26, %v247_v23  ;;  %v263_v59 = vmul.f32 %v255_v28, %v247_v23 }
  0x9b   : > { %v268_v54 = vadd.f32 %v260_v43, %v222_v15  ;;  %v269_v55 = vadd.f32 %v261_v44, %v222_v15  ;;  %v270_v15 = vadd.f32 %v262_v58, %v770_v18  ;;  %v271_v16 = vadd.f32 %v263_v59, %v770_v18 }
  0x9d   : > { %v350_v30 = vpop.permute.xlu2 %349  ;;  %v308_v18 = vadd.f32 %v300_v12, %v270_v15  ;;  %v309_v29 = vadd.f32 %v301_v14, %v271_v16 }
  0x9e   : > { %v370_v60 = vmul.f32 %v787_v47, %v350_v30  ;;  %v371_v63 = vmul.f32 %v791_v50, %v350_v30 }
  0xa1   : > { %v282_v35 = vpop.permute.xlu1 %281  ;;  %v783_v36 = vpop.permute.xlu0 %277 }
  0xa2   : > { %v298_v48 = vmul.f32 %v779_v32, %v282_v35  ;;  %v299_v49 = vmul.f32 %v781_v34, %v282_v35  ;;  %v296_v35 = vmul.f32 %v779_v32, %v783_v36  ;;  %v297_v37 = vmul.f32 %v781_v34, %v783_v36 }
  0xa3   : > { %v335_v34 = vmul.f32 %v331_v56, %v777_v20 }
  0xa4   : > { %v306_v61 = vadd.f32 %v298_v48, %v268_v54  ;;  %v307_v62 = vadd.f32 %v299_v49, %v269_v55  ;;  %v304_v36 = vadd.f32 %v296_v35, %v266_v39  ;;  %v305_v43 = vadd.f32 %v297_v37, %v267_v40 }
  0xa5   : > { %v358_v52 = vpop.permute.xlu2 %357 }
  0xa6   : > { %v374_v2 = vmul.f32 %v787_v47, %v358_v52  ;;  %v375_v7 = vmul.f32 %v791_v50, %v358_v52  ;;  %v342_v19 = vadd.f32 %v334_v42, %v304_v36  ;;  %v343_v45 = vadd.f32 %v335_v34, %v305_v43 }
  0xaa   : > { %v312_v0 = vpop.permute.xlu1 %311  ;;  %v320_v1 = vpop.permute.xlu0 %319 }
  0xab   : > { %v332_v3 = vmul.f32 %v330_v51, %v312_v0  ;;  %v333_v4 = vmul.f32 %v331_v56, %v312_v0  ;;  %v336_v5 = vmul.f32 %v330_v51, %v320_v1  ;;  %v337_v6 = vmul.f32 %v331_v56, %v320_v1 }
  0xad   : > { %v340_v8 = vadd.f32 %v332_v3, %v302_v53  ;;  %v341_v9 = vadd.f32 %v333_v4, %v303_v57  ;;  %v344_v10 = vadd.f32 %v336_v5, %v306_v61  ;;  %v345_v11 = vadd.f32 %v337_v6, %v307_v62 }
  0xaf   : > { %v378_v21 = vadd.f32 %v370_v60, %v340_v8  ;;  %v379_v22 = vadd.f32 %v371_v63, %v341_v9  ;;  %v382_v23 = vadd.f32 %v374_v2, %v344_v10  ;;  %v383_v24 = vadd.f32 %v375_v7, %v345_v11 }
  0xb1   : > { %386 = vst [vmem:[%s806_s5] sm:$0xff] %v378_v21 }
  0xb2   : > { %387 = vst [vmem:[%s806_s5 + $0x8] sm:$0xff] %v379_v22  ;;  %v324_v17 = vpop.permute.xlu1 %323 }
  0xb3   : > { %390 = vst [vmem:[%s806_s5 + $0x20] sm:$0xff] %v382_v23  ;;  %v338_v30 = vmul.f32 %v330_v51, %v324_v17  ;;  %v339_v31 = vmul.f32 %v331_v56, %v324_v17  ;;  %v362_v33 = vpop.permute.xlu0 %361 }
  0xb4   : > { %391 = vst [vmem:[%s806_s5 + $0x28] sm:$0xff] %v383_v24  ;;  %v376_v13 = vmul.f32 %v787_v47, %v362_v33  ;;  %v377_v26 = vmul.f32 %v791_v50, %v362_v33 }
  0xb5   : > { %v346_v28 = vadd.f32 %v338_v30, %v308_v18  ;;  %v347_v38 = vadd.f32 %v339_v31, %v309_v29 }
  0xb7   : > { %v384_v41 = vadd.f32 %v376_v13, %v346_v28  ;;  %v385_v32 = vadd.f32 %v377_v26, %v347_v38 }
  0xb9   : > { %392 = vst [vmem:[%s806_s5 + $0x30] sm:$0xff] %v384_v41 }
  0xba   : > { %393 = vst [vmem:[%s806_s5 + $0x38] sm:$0xff] %v385_v32 }
  0xbb   : > { %v354_v44 = vpop.permute.xlu1 %353 }
  0xbc   : > { %v372_v46 = vmul.f32 %v787_v47, %v354_v44  ;;  %v373_v20 = vmul.f32 %v791_v50, %v354_v44 }
  0xbe   : > { %v380_v48 = vadd.f32 %v372_v46, %v342_v19  ;;  %v381_v49 = vadd.f32 %v373_v20, %v343_v45 }
  0xc0   : > { %388 = vst [vmem:[%s806_s5 + $0x10] sm:$0xff] %v380_v48 }
  0xc1   : > { %389 = vst [vmem:[%s806_s5 + $0x18] sm:$0xff] %v381_v49 }
  0xc2   : > { %606 = shalt.err (!%p603_p5)
}
  0xc3   : > { %s663_s29 = smov 256   ;;  %s664_s30 = smov 16  }
  0xc4   : > { %506 = dma.vmem_to_hbm [thread:$0]  (%p725_p4), %s410_s15, 1024, %s412_s10, %s395_s11, %s663_s29, %s663_s29, %s664_s30  }
  0xc5 PF: > { %p512_p6 = scmp.ge.s32.totalorder %s657_s17, 2  ;;  %s426_s4 = sand.u32 1, %s637_s12  }
  0xc6   : > { %s427_s5 = scalar_lea.sflag [#allocation3], %s426_s4 }
  0xc7   : > { %p509_p7 = pnand %p512_p6, %p732_p8 }
  0xc9   : > { %p510_p9 = pneg %p509_p7 }
  0xcb   : > { %632 = dma.done.wait (%p510_p9), %s427_s5, 1024  }
  0xcc   : > { %634 = vsyncadd (%p510_p9), %s427_s5, 4294966272  ;;  %s16_s17 = sadd.s32 1, %s657_s17   ;;  %s875_s12 = smov %s641_s13 }
  0xcd   : > { %p13_p10 = scmp.ge.s32.totalorder %s16_s17, 4   ;;  %s876_s13 = smov %s645_s14 }
  0xce   : > { %s877_s14 = smov %s738_s25  ;;  %s878_s15 = smov %s653_s16 }
  0xcf   : > { %s879_s16 = smov %s881_s20  ;;  %15 = sbr.rel (!%p13_p10) target bundleno = 4 (0x4), region = 67 }
  0xd4   :  { %433 = vsyncpa [#allocation3], 1 }
  0xd5   :  { %435 = vsyncpa [#allocation3 + $0x1], 1 }

</bundles_post_ra>
